<compile_context>
chip_gen: v5e
topology: v5e:2x2
jax: 0.10.0
libtpu: 0.0.40
codegen_flags: <defaults>
</compile_context>

<pallas_src>
import math
import jax
import jax.numpy as jnp
from jax.experimental import pallas as pl
from jax.experimental.pallas import tpu as pltpu

EPS = 1e-6


def _round_up(x, m):
    return (x + m - 1) // m * m


def _sublane_pack(dtype):
    # f32 -> 8, bf16 -> 16, int8/fp8 -> 32 rows per packed sublane tile.
    return {1: 32, 2: 16}.get(jnp.dtype(dtype).itemsize, 8)


def _pad2(a, rows, cols):
    r, c = a.shape
    if r == rows and c == cols:          # skip the HBM copy when not needed
        return a
    return jnp.pad(a, ((0, rows - r), (0, cols - c)))


def _vmem_need_bytes(tm, tn, tk, r2, x_bytes, w_bytes, y_bytes):
    """Double-buffered input/output tiles + f32 accumulator scratch."""
    dbuf = 2 * (tm * tk * x_bytes        # x tile
                + tk * tn * w_bytes      # Wt tile
                + tm * r2 * 4            # xa tile (f32)
                + r2 * tn * w_bytes      # BcatT tile
                + tn * 4                 # bias tile (f32)
                + tm * tn * y_bytes)     # y tile
    return dbuf + tm * tn * 4            # accumulator


def _pick_tiles(max_batch, out_f, in_f, r2, x_bytes, w_bytes,
                budget=40 << 20):
    """Largest lane-dense (tn, tk) under the VMEM budget; tm covers batch."""
    tm = min(_round_up(max(max_batch, 1), 32), 256)
    np_full = _round_up(out_f, 128)
    kp_full = _round_up(in_f, 128)
    best = None
    for tn in (2048, 1024, 512, 256, 128):
        tn_c = min(tn, np_full)
        for tk in (1024, 512, 256, 128):
            tk_c = min(tk, kp_full)
            need = _vmem_need_bytes(tm, tn_c, tk_c, r2, x_bytes, w_bytes,
                                    x_bytes)
            if need <= budget:
                score = tn_c * tk_c
                if best is None or score > best[0]:
                    best = (score, tn_c, tk_c)
    if best is None:
        best = (0, min(128, np_full), min(128, kp_full))
    return tm, best[1], best[2]


def delora_kernel(x_ref, wt_ref, xa_ref, bt_ref, bias_ref, y_ref, acc_ref):
    """One (i, j, k) grid step of  y = x @ Wt + xa @ BcatT + bias."""
    k = pl.program_id(2)

    # Dense path: (tm, tk) x (tk, tn) -> (tm, tn), f32 accumulate on MXU.
    part = jnp.dot(x_ref[...], wt_ref[...], preferred_element_type=jnp.float32)

    @pl.when(k == 0)
    def _():
        acc_ref[...] = part          # direct store: no (tm, tn) zero-fill pass

    @pl.when(k > 0)
    def _():
        acc_ref[...] += part

    @pl.when(k == pl.num_programs(2) - 1)
    def _():
        # Folded low-rank delta, computed once per (i, j) tile in the epilogue.
        dy = jnp.dot(xa_ref[...].astype(bt_ref.dtype), bt_ref[...],
                     preferred_element_type=jnp.float32)       # (tm, tn)
        y_ref[...] = (acc_ref[...] + dy + bias_ref[...]).astype(y_ref.dtype)


def delora_prepare(W, A, B, A0, B0, lam, lam0, r, bias=None, *,
                   max_batch=256, tn=None, tk=None):
    """One-time work on the frozen weights (W is frozen in DeLoRA)."""
    out_f, in_f = W.shape
    f32 = jnp.float32

    # ---- scalar / per-rank glue (tiny, f32) ----
    norm_W = jnp.sqrt(jnp.sum(W.astype(f32) ** 2))
    c = jnp.asarray(lam, f32) * norm_W / r
    c0 = jnp.asarray(lam0, f32) * norm_W / r
    norm_b = jnp.sqrt(jnp.sum(B.astype(f32) ** 2, axis=0))
    norm_a = jnp.sqrt(jnp.sum(A.astype(f32) ** 2, axis=1))
    xi = 1.0 / (norm_b * norm_a + EPS)
    norm_b0 = jnp.sqrt(jnp.sum(B0.astype(f32) ** 2, axis=0))
    norm_a0 = jnp.sqrt(jnp.sum(A0.astype(f32) ** 2, axis=1))
    xi0 = 1.0 / (norm_b0 * norm_a0 + EPS)

    # Fold scale, xi and the subtraction into a signed concatenated B:
    #   Bcat = [ c*B*diag(xi) | -c0*B0*diag(xi0) ]   (out, 2r)
    #   Acat = [ A ; A0 ]                            (2r, in)
    Bcat = jnp.concatenate(
        [B.astype(f32) * (c * xi)[None, :],
         -B0.astype(f32) * (c0 * xi0)[None, :]], axis=1).astype(W.dtype)
    Acat = jnp.concatenate([A, A0], axis=0).astype(W.dtype)
    r2 = Acat.shape[0]

    # ---- tile sizes (lane-dense N/K multiples of 128) ----
    w_bytes = jnp.dtype(W.dtype).itemsize
    tm_max, tn_d, tk_d = _pick_tiles(max_batch, out_f, in_f, r2,
                                     w_bytes, w_bytes)
    tn = tn_d if tn is None else min(tn, _round_up(out_f, 128))
    tk = tk_d if tk is None else min(tk, _round_up(in_f, 128))
    np_ = _round_up(out_f, tn)
    kp = _round_up(in_f, tk)

    # Pre-transpose + pad the frozen operands ONCE (no per-call W traffic).
    # TODO(synk): optional fp8 (v7x) / int8 (v5e/v6e) quantization of Wt here.
    Wt = _pad2(jnp.transpose(W), kp, np_)            # (kp, np_)  K-major
    BcatT = _pad2(jnp.transpose(Bcat), r2, np_)      # (r2, np_)
    if bias is None:
        bias2d = jnp.zeros((1, np_), f32)
    else:
        bias2d = _pad2(bias.astype(f32).reshape(1, -1), 1, np_)

    return dict(Wt=Wt, BcatT=BcatT, Acat=Acat, bias2d=bias2d,
                out_features=out_f, in_features=in_f, r2=r2,
                tm_max=tm_max, tn=tn, tk=tk, np_=np_, kp=kp)


def delora_apply(prep, x, *, tm=None):
    """Per-call forward: y = x @ W^T + low-rank delta (+ bias)."""
    batch, in_f = x.shape
    assert in_f == prep["in_features"]
    out_f, np_, kp = prep["out_features"], prep["np_"], prep["kp"]
    tn, tk, r2 = prep["tn"], prep["tk"], prep["r2"]

    if tm is None:
        tm = min(_round_up(batch, _sublane_pack(x.dtype)), prep["tm_max"])
    mp = _round_up(batch, tm)

    # Hoisted low-rank projection: computed once per call (not per N tile).
    xa = jax.lax.dot_general(x, prep["Acat"], (((1,), (1,)), ((), ())),
                             preferred_element_type=jnp.float32)   # (batch, r2)

    xp = _pad2(x, mp, kp)
    xap = _pad2(xa, mp, r2)

    grid = (mp // tm, np_ // tn, kp // tk)

    x_bytes = jnp.dtype(x.dtype).itemsize
    w_bytes = jnp.dtype(prep["Wt"].dtype).itemsize
    need = _vmem_need_bytes(tm, tn, tk, r2, x_bytes, w_bytes, x_bytes)
    vmem_limit = int(max(need + (8 << 20), 32 << 20))

    y = pl.pallas_call(
        delora_kernel,
        out_shape=jax.ShapeDtypeStruct((mp, np_), x.dtype),
        grid=grid,
        in_specs=[
            pl.BlockSpec((tm, tk), lambda i, j, k: (i, k)),   # x
            pl.BlockSpec((tk, tn), lambda i, j, k: (k, j)),   # Wt (frozen)
            pl.BlockSpec((tm, r2), lambda i, j, k: (i, 0)),   # xa (hoisted)
            pl.BlockSpec((r2, tn), lambda i, j, k: (0, j)),   # BcatT (folded)
            pl.BlockSpec((1, tn), lambda i, j, k: (0, j)),    # bias
        ],
        out_specs=pl.BlockSpec((tm, tn), lambda i, j, k: (i, j)),
        scratch_shapes=[pltpu.VMEM((tm, tn), jnp.float32)],   # f32 accumulator
        compiler_params=pltpu.CompilerParams(
            dimension_semantics=("parallel", "parallel", "arbitrary"),
            vmem_limit_bytes=vmem_limit),
    )(xp, prep["Wt"], xap, prep["BcatT"], prep["bias2d"])

    return y[:batch, :out_f]


def delora_forward(x, W, A, B, A0, B0, lam, lam0, r, bias=None, **kw):
    """One-shot convenience wrapper (prepare + apply)."""
    prep = delora_prepare(W, A, B, A0, B0, lam, lam0, r, bias=bias,
                          max_batch=x.shape[0], **kw)
    return delora_apply(prep, x)


def delora_reference(x, W, A, B, A0, B0, lam, lam0, r, bias=None, eps=EPS):
    """Pure-JAX reference (intended per-rank diagonal xi semantics)."""
    norm_W = jnp.sqrt(jnp.sum(W.astype(jnp.float32) ** 2))
    xi = 1.0 / (jnp.linalg.norm(B, axis=0) * jnp.linalg.norm(A, axis=1) + eps)
    xi0 = 1.0 / (jnp.linalg.norm(B0, axis=0) * jnp.linalg.norm(A0, axis=1) + eps)
    wx = x @ W.T
    dy = lam * norm_W / r * (((x @ A.T) * xi[None, :]) @ B.T)
    dy0 = lam0 * norm_W / r * (((x @ A0.T) * xi0[None, :]) @ B0.T)
    y = wx + dy - dy0
    if bias is not None:
        y = y + bias[None, :]
    return y


if __name__ == "__main__":
    batch, in_features, out_features, r = 8, 256, 256, 8

    key = jax.random.PRNGKey(0)
    k_w, k_a, k_b, k_a0, k_b0, k_x, k_bias = jax.random.split(key, 7)

    # Kaiming-normal-like init (a=sqrt(5) => gain=sqrt(1/3), std=gain/sqrt(fan_in))
    gain = math.sqrt(2.0 / (1.0 + 5.0))
    W = jax.random.normal(k_w, (out_features, in_features), jnp.float32) * 0.05
    A = jax.random.normal(k_a, (r, in_features), jnp.float32) * (gain / math.sqrt(in_features))
    B = jax.random.normal(k_b, (out_features, r), jnp.float32) * (gain / math.sqrt(r))
    # deterministic stand-ins for the (otherwise uninitialized) B0/A0 buffers
    A0 = jax.random.normal(k_a0, (r, in_features), jnp.float32) * (gain / math.sqrt(in_features))
    B0 = jax.random.normal(k_b0, (out_features, r), jnp.float32) * (gain / math.sqrt(r))

    lam = jnp.float32(1.0)    # lambda_param (lambda_init = 1.0)
    lam0 = jnp.float32(1.0)   # lambda0 buffer

    x = jax.random.normal(k_x, (batch, in_features), jnp.float32)

    # --- 1) no-bias path, small tiles to exercise multi-tile N and the
    #         K-accumulation path: grid = (1, 2, 2). ---
    prep = delora_prepare(W, A, B, A0, B0, lam, lam0, r, bias=None,
                          max_batch=batch, tn=128, tk=128)
    y = jax.block_until_ready(delora_apply(prep, x, tm=8))
    y_ref = delora_reference(x, W, A, B, A0, B0, lam, lam0, r)
    assert y.shape == (batch, out_features)
    assert jnp.allclose(y, y_ref, atol=1e-4, rtol=1e-4), "mismatch vs reference"

    # --- 2) fused-bias path with default (auto-budgeted) tiles: grid (1,1,1),
    #         exercising the k==0 == k==last single-step epilogue. ---
    bias = jax.random.normal(k_bias, (out_features,), jnp.float32) * 0.1
    prep_b = delora_prepare(W, A, B, A0, B0, lam, lam0, r, bias=bias,
                            max_batch=batch)
    y_b = jax.block_until_ready(delora_apply(prep_b, x))
    y_b_ref = delora_reference(x, W, A, B, A0, B0, lam, lam0, r, bias=bias)
    assert jnp.allclose(y_b, y_b_ref, atol=1e-4, rtol=1e-4), "bias path mismatch"

    print("KERNEL_OK")
</pallas_src>

<mosaic_0001>
module attributes {stable_mosaic.version = 11 : i64} {
  func.func @delora_kernel(%arg0: i32, %arg1: i32, %arg2: i32, %arg3: memref<8x128xf32, #tpu.memory_space<vmem>>, %arg4: memref<128x128xf32, #tpu.memory_space<vmem>>, %arg5: memref<8x16xf32, #tpu.memory_space<vmem>>, %arg6: memref<16x128xf32, #tpu.memory_space<vmem>>, %arg7: memref<1x128xf32, #tpu.memory_space<vmem>>, %arg8: memref<8x128xf32, #tpu.memory_space<vmem>>, %arg9: memref<8x128xf32, #tpu.memory_space<vmem>>) attributes {dimension_semantics = [#tpu.dimension_semantics<parallel>, #tpu.dimension_semantics<parallel>, #tpu.dimension_semantics<arbitrary>], iteration_bounds = array<i64: 1, 2, 2>, scalar_prefetch = 0 : i64, scratch_operands = 1 : i64, tpu.core_type = #tpu.core_type<tc>, window_params = [{transform_indices = @transform_0, window_bounds = array<i64: 8, 128>}, {transform_indices = @transform_1, window_bounds = array<i64: 128, 128>}, {transform_indices = @transform_2, window_bounds = array<i64: 8, 16>}, {transform_indices = @transform_3, window_bounds = array<i64: 16, 128>}, {transform_indices = @transform_4, window_bounds = array<i64: 1, 128>}, {transform_indices = @transform_5, window_bounds = array<i64: 8, 128>}]} {
    %c0 = arith.constant 0 : index
    %c0_0 = arith.constant 0 : index
    %0 = vector.load %arg3[%c0, %c0_0] : memref<8x128xf32, #tpu.memory_space<vmem>>, vector<8x128xf32>
    %c0_1 = arith.constant 0 : index
    %c0_2 = arith.constant 0 : index
    %1 = vector.load %arg4[%c0_1, %c0_2] : memref<128x128xf32, #tpu.memory_space<vmem>>, vector<128x128xf32>
    %cst = arith.constant dense<0.000000e+00> : vector<8x128xf32>
    %2 = tpu.matmul %0, %1, %cst {dimension_numbers = #tpu.dot_dimension_numbers<[1], [0], [0], [1], [0, 0, 1, 1], [], []>} : vector<8x128xf32>, vector<128x128xf32>, vector<8x128xf32> -> vector<8x128xf32>
    %c0_i32 = arith.constant 0 : i32
    %3 = arith.cmpi eq, %arg2, %c0_i32 : i32
    %4 = arith.extui %3 : i1 to i32
    %c0_i32_3 = arith.constant 0 : i32
    %5 = arith.cmpi ne, %4, %c0_i32_3 : i32
    scf.if %5 {
      %c0_7 = arith.constant 0 : index
      %c0_8 = arith.constant 0 : index
      %12 = vector.load %arg9[%c0_7, %c0_8] : memref<8x128xf32, #tpu.memory_space<vmem>>, vector<8x128xf32>
      tpu.vector_store %arg9[%c0_7, %c0_8], %2 {strides = array<i32>} : memref<8x128xf32, #tpu.memory_space<vmem>>, vector<8x128xf32>,
    } else {
    }
    %c0_i32_4 = arith.constant 0 : i32
    %6 = arith.cmpi sgt, %arg2, %c0_i32_4 : i32
    %7 = arith.extui %6 : i1 to i32
    %c0_i32_5 = arith.constant 0 : i32
    %8 = arith.cmpi ne, %7, %c0_i32_5 : i32
    scf.if %8 {
      %c0_7 = arith.constant 0 : index
      %c0_8 = arith.constant 0 : index
      %12 = vector.load %arg9[%c0_7, %c0_8] : memref<8x128xf32, #tpu.memory_space<vmem>>, vector<8x128xf32>
      %13 = arith.addf %12, %2 : vector<8x128xf32>
      %c0_9 = arith.constant 0 : index
      %c0_10 = arith.constant 0 : index
      %14 = vector.load %arg9[%c0_9, %c0_10] : memref<8x128xf32, #tpu.memory_space<vmem>>, vector<8x128xf32>
      tpu.vector_store %arg9[%c0_9, %c0_10], %13 {strides = array<i32>} : memref<8x128xf32, #tpu.memory_space<vmem>>, vector<8x128xf32>,
    } else {
    }
    %c1_i32 = arith.constant 1 : i32
    %9 = arith.cmpi eq, %arg2, %c1_i32 : i32
    %10 = arith.extui %9 : i1 to i32
    %c0_i32_6 = arith.constant 0 : i32
    %11 = arith.cmpi ne, %10, %c0_i32_6 : i32
    scf.if %11 {
      %c0_7 = arith.constant 0 : index
      %c0_8 = arith.constant 0 : index
      %12 = vector.load %arg5[%c0_7, %c0_8] : memref<8x16xf32, #tpu.memory_space<vmem>>, vector<8x16xf32>
      %c0_9 = arith.constant 0 : index
      %c0_10 = arith.constant 0 : index
      %13 = vector.load %arg6[%c0_9, %c0_10] : memref<16x128xf32, #tpu.memory_space<vmem>>, vector<16x128xf32>
      %cst_11 = arith.constant dense<0.000000e+00> : vector<8x128xf32>
      %14 = tpu.matmul %12, %13, %cst_11 {dimension_numbers = #tpu.dot_dimension_numbers<[1], [0], [0], [1], [0, 0, 1, 1], [], []>} : vector<8x16xf32>, vector<16x128xf32>, vector<8x128xf32> -> vector<8x128xf32>
      %c0_12 = arith.constant 0 : index
      %c0_13 = arith.constant 0 : index
      %15 = vector.load %arg9[%c0_12, %c0_13] : memref<8x128xf32, #tpu.memory_space<vmem>>, vector<8x128xf32>
      %16 = arith.addf %15, %14 : vector<8x128xf32>
      %c0_14 = arith.constant 0 : index
      %c0_15 = arith.constant 0 : index
      %17 = vector.load %arg7[%c0_14, %c0_15] : memref<1x128xf32, #tpu.memory_space<vmem>>, vector<1x128xf32>
      %18 = vector.broadcast %17 : vector<1x128xf32> to vector<8x128xf32>
      %19 = arith.addf %16, %18 : vector<8x128xf32>
      %c0_16 = arith.constant 0 : index
      %c0_17 = arith.constant 0 : index
      %20 = vector.load %arg8[%c0_16, %c0_17] : memref<8x128xf32, #tpu.memory_space<vmem>>, vector<8x128xf32>
      tpu.vector_store %arg8[%c0_16, %c0_17], %19 {strides = array<i32>} : memref<8x128xf32, #tpu.memory_space<vmem>>, vector<8x128xf32>,
    } else {
    }
    return
  }
  func.func @transform_0(%arg0: i32, %arg1: i32, %arg2: i32) -> (i32, i32) {
    %c0_i32 = arith.constant 0 : i32
    return %arg0, %arg2 : i32, i32
  }
  func.func @transform_1(%arg0: i32, %arg1: i32, %arg2: i32) -> (i32, i32) {
    %c0_i32 = arith.constant 0 : i32
    return %arg2, %arg1 : i32, i32
  }
  func.func @transform_2(%arg0: i32, %arg1: i32, %arg2: i32) -> (i32, i32) {
    %c0_i32 = arith.constant 0 : i32
    %c0_i32_0 = arith.constant 0 : i32
    return %arg0, %c0_i32 : i32, i32
  }
  func.func @transform_3(%arg0: i32, %arg1: i32, %arg2: i32) -> (i32, i32) {
    %c0_i32 = arith.constant 0 : i32
    %c0_i32_0 = arith.constant 0 : i32
    return %c0_i32, %arg1 : i32, i32
  }
  func.func @transform_4(%arg0: i32, %arg1: i32, %arg2: i32) -> (i32, i32) {
    %c0_i32 = arith.constant 0 : i32
    %c0_i32_0 = arith.constant 0 : i32
    return %c0_i32, %arg1 : i32, i32
  }
  func.func @transform_5(%arg0: i32, %arg1: i32, %arg2: i32) -> (i32, i32) {
    %c0_i32 = arith.constant 0 : i32
    return %arg0, %arg1 : i32, i32
  }
}

</mosaic_0001>

<bundles_post_ra>
// kernel: tpu_custom_call.1
= control target key start
LH: loop header
LB: loop body
LE: loop exit
PB: predicated region body
PF: predicated region fallthrough
CT: control target
= control target key end

     0   :  { %s1498_s0 = inlined_call_operand.hbm [shape: f32[8,256], index: 0, kind: input, shape index: {}]   ;;  %s1499_s1 = inlined_call_operand.hbm [shape: f32[256,256], index: 1, kind: input, shape index: {}]   ;;  %s1500_s2 = inlined_call_operand.hbm [shape: f32[8,16], index: 2, kind: input, shape index: {}]   ;;  %s1501_s3 = inlined_call_operand.hbm [shape: f32[16,256], index: 3, kind: input, shape index: {}]   ;;  %s1502_s4 = inlined_call_operand.vmem [shape: f32[1,256], index: 4, kind: input, shape index: {}]   ;;  %s1503_s5 = inlined_call_operand.hbm [shape: f32[8,256], index: 5, kind: output, shape index: {}]  }
   0x1   :  { %1518 = sst [smem:[#allocation31_spill]] %s1498_s0 }
   0x2   :  { %1519 = sst [smem:[#allocation32_spill]] %s1499_s1 }
   0x3   :  { %1520 = sst [smem:[#allocation33_spill]] %s1500_s2 }
   0x4   :  { %1521 = sst [smem:[#allocation34_spill]] %s1502_s4 }
   0x5   :  { %1522 = sst [smem:[#allocation35_spill]] %s1503_s5 }
   0x6   :  { %10 = vsyncpa [#allocation4], 0 }
   0x7   :  { %12 = vsyncpa [#allocation4 + $0x1], 0 }
   0x8   :  { %13 = vsyncpa [#allocation7], 0 }
   0x9   :  { %15 = vsyncpa [#allocation7 + $0x1], 0 }
   0xa   :  { %16 = vsyncpa [#allocation10], 0 }
   0xb   :  { %18 = vsyncpa [#allocation10 + $0x1], 0 }
   0xc   :  { %19 = vsyncpa [#allocation5], 0 }
   0xd   :  { %21 = vsyncpa [#allocation5 + $0x1], 0  ;;  %s1145_s18 = smov 0   ;;  %s1147_s19 = smov 0  }
   0xe   :  { %s1149_s20 = smov 0   ;;  %s1151_s21 = smov 0  }
   0xf   :  { %s1153_s22 = smov 0   ;;  %s1155_s23 = smov 0  }
  0x10   :  { %s1157_s24 = smov 0   ;;  %s1159_s25 = smov 0  }
  0x11   :  { %s1161_s26 = smov 0   ;;  %s1163_s27 = smov 0  }
  0x12   :  { %s1165_s28 = smov 0   ;;  %s1167_s29 = smov 0  }
  0x13   :  { %s1169_s30 = smov 0   ;;  %s1171_s6 = smov 0  }
  0x14 LB: > { %1523 = sst [smem:[#allocation17_spill]] %s1057_s18  ;;  %s1214_s7 = sadd.s32 4294967295, %s1109_s6   ;;  %s1109_s6 = sphi %s1171_s6, %s27_s6   ;;  %s1105_s30 = sphi %s1169_s30, %s1585_s30   ;;  %s1101_s29 = sphi %s1167_s29, %s1574_s29   ;;  %s1097_s28 = sphi %s1165_s28, %s1584_s28   ;;  %s1093_s27 = sphi %s1163_s27, %s1573_s27   ;;  %s1089_s26 = sphi %s1161_s26, %s1583_s26   ;;  %s1085_s25 = sphi %s1159_s25, %s1582_s25   ;;  %s1081_s24 = sphi %s1157_s24, %s1581_s24   ;;  %s1077_s23 = sphi %s1155_s23, %s1570_s23   ;;  %s1073_s22 = sphi %s1153_s22, %s1580_s22   ;;  %s1069_s21 = sphi %s1151_s21, %s1579_s21   ;;  %s1065_s20 = sphi %s1149_s20, %s1578_s20   ;;  %s1061_s19 = sphi %s1147_s19, %s1577_s19   ;;  %s1057_s18 = sphi %s1145_s18, %s1576_s18  }
  0x15   : > { %1524 = sst [smem:[#allocation18_spill]] %s1077_s23  ;;  %s653_s8 = sadd.s32 4294967294, %s1109_s6  }
  0x16   : > { %1525 = sst [smem:[#allocation19_spill]] %s1089_s26  ;;  %p1508_p0 = scmp.eq.s32.totalorder %s1214_s7, 0 }
  0x17   : > { %1526 = sst [smem:[#allocation20_spill]] %s1093_s27  ;;  %p96_p1 = scmp.ne.s32.totalorder %s1073_s22, %s1069_s21 }
  0x18   : > { %1527 = sst [smem:[#allocation21_spill]] %s1097_s28  ;;  %p148_p2 = scmp.ne.s32.totalorder %s1061_s19, %s1057_s18 }
  0x19   : > { %1528 = sst [smem:[#allocation22_spill]] %s1101_s29  ;;  %p1224_p4 = por %p96_p1, %p1508_p0 }
  0x1a   : > { %1529 = sst [smem:[#allocation23_spill]] %s1109_s6  ;;  %p206_p5 = scmp.eq.s32.totalorder %s653_s8, 3 }
  0x1b   : > { %p1230_p6 = por %p148_p2, %p1508_p0  ;;  %p654_p7 = scmp.ge.s32.totalorder %s1109_s6, 1 }
  0x1c   : > { %p1235_p8 = por %p206_p5, %p148_p2  ;;  %p213_p9 = scmp.lt.s32.totalorder %s1109_s6, 5 }
  0x1d   : > { %s1534_s2 = sld [smem:[#allocation33_spill]]  ;;  %s1111_s16 = smov [#allocation8]  }
  0x1e   : > { %s1532_s11 = scalar_select %p1235_p8, 1, 0 }
  0x1f   : > { %p1243_p10 = pnand %p654_p7, %p213_p9  ;;  %s229_s17 = sshll.u32 %s1111_s16, 4  ;;  %s230_s17 = int_to_ptr.vmem [resolvable:$true] %s229_s17 }
  0x20   : > { %1533 = sst [smem:[#allocation24_spill]] %s1532_s11  ;;  %s39_s21 = sadd.s32 1, %s1101_s29 }
  0x21   : > { %p692_p11 = pneg %p1243_p10  ;;  %p40_p13 = scmp.ge.s32.totalorder %s39_s21, 2 }
  0x22   : > { %s42_s8 = sadd.s32 1, %s1105_s30  ;;  %s55_s12 = sadd.s32 1, %s1089_s26 }
  0x23   : > { %s227_s14 = sshll.u32 %s1534_s2, 4  ;;  %p693_p12 = pnand %p692_p11, %p1508_p0  ;;  %s228_s14 = int_to_ptr.hbm [resolvable:$true] %s227_s14 }
  0x24   : > { %p62_p1 = scmp.ne.s32.totalorder %s1089_s26, %s1085_s25  ;;  %s1587_s21 = smov (%p40_p13, %s39_s21), 0 }
  0x25   : > { %695 = dma.hbm_to_vmem [thread:$0]  (!%p693_p12), %s228_s14, 128, %s230_s17, [#allocation7]  }
  0x26   : > { %1536 = sst [smem:[#allocation25_spill]] %s1587_s21  ;;  %s1589_s8 = smov (!%p40_p13, %s42_s8), %s1105_s30 }
  0x27   : > { %s51_s13 = ssub.s32 %s1101_s29, %s1587_s21  ;;  %p63_p2 = scmp.eq.s32.totalorder %s1109_s6, 0 }
  0x28   : > { %p44_p5 = scmp.ge.s32.totalorder %s1589_s8, 2  ;;  %p53_p7 = scmp.eq.s32.totalorder %s51_s13, 0 }
  0x29   : > { %p1264_p9 = por %p63_p2, %p62_p1  ;;  %p68_p11 = scmp.ne.s32.totalorder %s1085_s25, %s1081_s24 }
  0x2a   : > { %s1591_s8 = smov (%p44_p5, %s1589_s8), 0  ;;  %s83_s11 = sadd.s32 1, %s1077_s23 }
  0x2b   : > { %1538 = sst [smem:[#allocation26_spill]] %s1591_s8  ;;  %p1277_p12 = por %p1508_p0, %p68_p11 }
  0x2c   : > { %s1273_s16 = scalar_select %p53_p7, %s1089_s26, %s55_s12  }
  0x2d   : > { %s79_s2 = ssub.s32 %s1105_s30, %s1591_s8  ;;  %p90_p1 = scmp.ne.s32.totalorder %s1077_s23, %s1073_s22 }
  0x2e   : > { %1539 = sst [smem:[#allocation27_spill]] %s1273_s16  ;;  %s80_s21 = sor.u32 %s79_s2, %s51_s13 }
  0x2f   : > { %p81_p13 = scmp.eq.s32.totalorder %s80_s21, 0  ;;  %p133_p3 = scmp.eq.s32.totalorder %s79_s2, 0 }
  0x30   : > { %s135_s24 = sadd.s32 1, %s1065_s20  ;;  %p1292_p5 = por %p90_p1, %p63_p2 }
  0x31   : > { %s1288_s18 = scalar_select %p81_p13, %s1077_s23, %s83_s11  }
  0x32   : > { %p142_p7 = scmp.ne.s32.totalorder %s1065_s20, %s1061_s19  ;;  %p1545_p13 = scmp.eq.s32.totalorder %s1214_s7, 3 }
  0x33   : > { %1541 = sst [smem:[#allocation28_spill]] %s1288_s18  ;;  %p711_p1 = scmp.lt.s32.totalorder %s1109_s6, 4 }
  0x34   : > { %s1299_s8 = scalar_select %p133_p3, %s1065_s20, %s135_s24  }
  0x35   : > { %p1303_p11 = por %p142_p7, %p63_p2  ;;  %p1309_p0 = por %p1545_p13, %p142_p7 }
  0x36   : > { %1543 = sst [smem:[#allocation29_spill]] %s1299_s8  ;;  %s240_s21 = sand.u32 1, %s1089_s26  }
  0x37   : > { %s1546_s11 = scalar_select %p1309_p0, 1, 0 }
  0x38   : > { %s657_s13 = sshll.u32 %s240_s21, 3  ;;  %s658_s16 = sshll.u32 %s1101_s29, 3 }
  0x39   : > { %1547 = sst [smem:[#allocation30_spill]] %s1546_s11  ;;  %s244_s5 = scalar_lea.vmem [#allocation3], %s657_s13 }
  0x3a   : > { %s1548_s0 = sld [smem:[#allocation31_spill]]  ;;  %s254_s27 = sshll.u32 %s244_s5, 4  ;;  %s255_s27 = int_to_ptr.vmem [resolvable:$true] %s254_s27 }
  0x3b   : > { %p697_p3 = pnand %p711_p1, %p1264_p9  ;;  %s679_s11 = sshll.u32 %s1101_s29, 5 }
  0x3c   : > { %p1328_p2 = pnand %p711_p1, %p1292_p5  ;;  %s270_s18 = sadd.s32 %s1105_s30, %s679_s11 }
  0x3d   : > { %s662_s13 = sshll.u32 %s270_s18, 3  ;;  %s1550_s1 = sld [smem:[#allocation32_spill]] }
  0x3e   : > { %p1340_p9 = pnand %p711_p1, %p1303_p11  ;;  %s263_s29 = sand.u32 1, %s1077_s23  }
  0x3f   : > { %s659_s11 = sshll.u32 %s263_s29, 7  ;;  %s1114_s2 = smov 8  }
  0x40   : > { %s250_s8 = scalar_lea.hbm %s1548_s0, %s658_s16  ;;  %s241_s16 = scalar_lea.sflag [#allocation4], %s240_s21 }
  0x41   : > { %s252_s4 = sshll.u32 %s250_s8, 4  ;;  %s261_s0 = sand.u32 1, %s1109_s6   ;;  %s253_s4 = int_to_ptr.hbm [resolvable:$true] %s252_s4 }
  0x42   : > { %699 = dma.hbm_to_vmem [thread:$0]  (!%p697_p3), %s253_s4, 128, %s255_s27, %s241_s16  }
  0x43   : > { %s272_s8 = scalar_lea.hbm %s1550_s1, %s662_s13  ;;  %s265_s21 = scalar_lea.vmem [#allocation6], %s659_s11 }
  0x44   : > { %s273_s12 = sshll.u32 %s272_s8, 4  ;;  %s275_s4 = sshll.u32 %s265_s21, 4  ;;  %s274_s12 = int_to_ptr.hbm [resolvable:$true] %s273_s12  ;;  %s276_s4 = int_to_ptr.vmem [resolvable:$true] %s275_s4 }
  0x45   : > { %s285_s27 = sand.u32 1, %s1065_s20   ;;  %s262_s18 = scalar_lea.sflag [#allocation7], %s261_s0 }
  0x46   : > { %s1112_s16 = smov 256   ;;  %s1113_s13 = smov 128  }
  0x47   : > { %702 = dma.hbm_to_vmem [thread:$0]  (!%p1328_p2), %s274_s12, 2048, %s276_s4, %s262_s18, %s1112_s16, %s1113_s13, %s1114_s2  }
  0x48   : > { %s663_s5 = sshll.u32 %s285_s27, 4  ;;  %s664_s24 = sshll.u32 %s1105_s30, 3 }
  0x49   : > { %s293_s8 = scalar_lea.hbm %s1501_s3, %s664_s24  ;;  %s289_s6 = scalar_lea.vmem [#allocation9], %s663_s5 }
  0x4a   : > { %s296_s23 = sshll.u32 %s289_s6, 4  ;;  %s294_s29 = sshll.u32 %s293_s8, 4  ;;  %s297_s23 = int_to_ptr.vmem [resolvable:$true] %s296_s23  ;;  %s295_s29 = int_to_ptr.hbm [resolvable:$true] %s294_s29 }
  0x4b   : > { %s286_s11 = scalar_lea.sflag [#allocation10], %s285_s27  ;;  %314 = sbr.rel (%p1243_p10) target bundleno = 437 (0x1b5), region = 40 }
  0x4c   : > { %705 = dma.hbm_to_vmem [thread:$0]  (!%p1340_p9), %s295_s29, 256, %s297_s23, %s286_s11, %s1112_s16, %s1113_s13, %s1114_s2  }
  0x4d   : > { %s316_s0 = sand.u32 (!%p1243_p10), 1, %s1085_s25  }
  0x4e   : > { %s1358_s26 = sshll.u32 (!%p1243_p10), %s316_s0, 3  ;;  %s317_s12 = scalar_lea.sflag (!%p1243_p10), [#allocation4], %s316_s0 }
  0x4f   : > { %s320_s1 = scalar_lea.vmem (!%p1243_p10), [#allocation3], %s1358_s26 }
  0x50   : > { %1036 = dma.done.wait (%p1277_p12), %s317_s12, 128  }
  0x51   : > { %1038 = vsyncadd (%p1277_p12), %s317_s12, 4294967168  ;;  %s326_s23 = sand.u32 1, %s1214_s7   ;;  %s328_s28 = sand.u32 1, %s1073_s22  }
  0x52   : > { %s667_s6 = sshll.u32 %s328_s28, 7  ;;  %s327_s15 = scalar_lea.sflag [#allocation7], %s326_s23 }
  0x53   : > { %s1367_s14 = scalar_lea.vmem [#allocation6], %s667_s6 }
  0x54   : > { %1040 = dma.done.wait (%p1224_p4), %s327_s15, 2048  }
  0x55   : > { %1042 = vsyncadd (%p1224_p4), %s327_s15, 4294965248  ;;  %p1552_p10 = scmp.eq.s32.totalorder %s1214_s7, 0 }
  0x57   : > { %1044 = dma.done.wait (%p1552_p10), [#allocation7], 128   ;;  %p1553_p5 = pmov %p1552_p10 }
  0x58   : > { %s1378_s17 = sand.u32 1, %s1061_s19  }
  0x59   : > { %1046 = vsyncadd (%p1553_p5), [#allocation7], 4294967168  ;;  %s669_s21 = sshll.u32 %s1378_s17, 4  ;;  %s342_s4 = scalar_lea.sflag [#allocation10], %s1378_s17 }
  0x5a   : > { %s1382_s27 = scalar_lea.vmem [#allocation9], %s669_s21 }
  0x5b   : > { %1048 = dma.done.wait (%p1230_p6), %s342_s4, 256  }
  0x5c   : > { %1050 = vsyncadd (%p1230_p6), %s342_s4, 4294967040  ;;  %s1554_s9 = sld [smem:[#allocation21_spill]]  ;;  %s670_s7 = sshll.u32 %s1378_s17, 3  ;;  %v406_v0 = vld [vmem:[%s1367_s14 + $0x78] sm:$0xff]  ;;  %v405_v1 = vld [vmem:[%s1367_s14 + $0x70] sm:$0xff] }
  0x5d   : > { %s1555_s10 = sld [smem:[#allocation34_spill]]  ;;  %407 = vmatpush.msra.mxu0 %v406_v0  ;;  %v404_v2 = vld [vmem:[%s1367_s14 + $0x68] sm:$0xff]  ;;  %v403_v3 = vld [vmem:[%s1367_s14 + $0x60] sm:$0xff]  ;;  %v402_v4 = vld [vmem:[%s1367_s14 + $0x58] sm:$0xff]  ;;  %s1417_s2 = scalar_lea.vmem [#allocation11], %s670_s7 }
  0x5e   : > { %v401_v5 = vld [vmem:[%s1367_s14 + $0x50] sm:$0xff]  ;;  %v400_v6 = vld [vmem:[%s1367_s14 + $0x48] sm:$0xff]  ;;  %v399_v7 = vld [vmem:[%s1367_s14 + $0x40] sm:$0xff]  ;;  %s1556_s5 = sld [smem:[#allocation20_spill]] }
  0x5f   : > { %408 = vmatpush.msra.mxu0 %v405_v1  ;;  %v398_v8 = vld [vmem:[%s1367_s14 + $0x38] sm:$0xff]  ;;  %v397_v9 = vld [vmem:[%s1367_s14 + $0x30] sm:$0xff]  ;;  %v396_v10 = vld [vmem:[%s1367_s14 + $0x28] sm:$0xff] }
  0x60   : > { %v395_v11 = vld [vmem:[%s1367_s14 + $0x20] sm:$0xff]  ;;  %v394_v12 = vld [vmem:[%s1367_s14 + $0x18] sm:$0xff]  ;;  %v393_v13 = vld [vmem:[%s1367_s14 + $0x10] sm:$0xff] }
  0x61   : > { %409 = vmatpush.msra.mxu0 %v404_v2  ;;  %v392_v14 = vld [vmem:[%s1367_s14 + $0x8] sm:$0xff]  ;;  %v391_v15 = vld [vmem:[%s1367_s14] sm:$0xff]  ;;  %v390_v16 = vld [vmem:[%s320_s1] sm:$0xff] }
  0x62   : > { %p387_p4 = scmp.lt.s32.totalorder %s1554_s9, 1 }
  0x63   : > { %410 = vmatpush.msra.mxu0 %v403_v3 }
  0x64   : > { %s1593_s9 = smov (!%p387_p4, %s1554_s9), 1  ;;  %p671_p6 = scmp.ne.s32.totalorder %s1556_s5, 0 }
  0x65   : > { %s389_s13 = scalar_lea.vmem %s1555_s10, %s1593_s9  ;;  %411 = vmatpush.msra.mxu0 %v402_v4 }
  0x67   : > { %412 = vmatpush.msra.mxu0 %v401_v5 }
  0x69   : > { %413 = vmatpush.msra.mxu0 %v400_v6 }
  0x6b   : > { %414 = vmatpush.msra.mxu0 %v399_v7 }
  0x6d   : > { %415 = vmatpush.msra.mxu0 %v398_v8 }
  0x6f   : > { %416 = vmatpush.msra.mxu0 %v397_v9 }
  0x71   : > { %417 = vmatpush.msra.mxu0 %v396_v10 }
  0x73   : > { %418 = vmatpush.msra.mxu0 %v395_v11 }
  0x75   : > { %419 = vmatpush.msra.mxu0 %v394_v12 }
  0x77   : > { %420 = vmatpush.msra.mxu0 %v393_v13 }
  0x79   : > { %421 = vmatpush.msra.mxu0 %v392_v14 }
  0x7b   : > { %422 = vmatpush.msra.mxu0 %v391_v15 }
  0x7c   : > { %423 = vmatmul.f32.vlgmr.msra.gmra.mxu0 %v390_v16 }
  0xf5   : > { %430 = sbr.rel (%p671_p6) target bundleno = 251 (0xfb), region = 60 }
  0xf9   : > { %v424_v17 = vpop.f32.mrf.mxu0 }
  0xfa   : > { %431 = vst [vmem:[#allocation2] sm:$0xff] %v424_v17 }
  0xfb PF: > { %s1557_s24 = sld [smem:[#allocation20_spill]] }
 0x101   : > { %p672_p12 = scmp.le.s32.totalorder %s1557_s24, 0 }
 0x103   : > { %435 = sbr.rel (%p672_p12) target bundleno = 268 (0x10c), region = 64 }
 0x108   : > { %v436_v18 = vld [vmem:[#allocation2] sm:$0xff] }
 0x109   : > { %v437_v19 = vadd.f32 %v436_v18, %v424_v17 }
 0x10b   : > { %438 = vst [vmem:[#allocation2] sm:$0xff] %v437_v19 }
 0x10c PF: > { %s1558_s8 = sld [smem:[#allocation20_spill]] }
 0x112   : > { %p673_p7 = scmp.ne.s32.totalorder %s1558_s8, 1 }
 0x114   : > { %442 = sbr.rel (%p673_p7) target bundleno = 416 (0x1a0), region = 68 }
 0x119   : > { %v445_v20 = vld [vmem:[%s1382_s27 + $0x8] sm:$0xff]  ;;  %v444_v21 = vld [vmem:[%s1382_s27] sm:$0xff]  ;;  %vm446_vm0 = vcmask 130048  }
 0x11a   : > { %464 = vmatpush.msra.mxu0 %v445_v20  ;;  %v443_v22 = vld [vmem:[#allocation8] sm:$0xff]  ;;  %v470_v23 = vld [vmem:[#allocation2] sm:$0xff] }
 0x11b   : > { %v830_v24 = vld [vmem:[%s389_s13] ss:$0 sm:$0xff] }
 0x11c   : > { %465 = vmatpush.msra.mxu0 %v444_v21 }
 0x11d   : > { %674 = vmatmul.msk.f32.vlgmr.msra.gmra.mxu0 %vm446_vm0, %v443_v22 }
 0x19a   : > { %v467_v25 = vpop.f32.mrf.mxu0 }
 0x19b   : > { %v471_v26 = vadd.f32 %v470_v23, %v467_v25 }
 0x19d   : > { %v476_v27 = vadd.f32 %v830_v24, %v471_v26 }
 0x19f   : > { %477 = vst [vmem:[%s1417_s2] sm:$0xff] %v476_v27 }
 0x1a0 PF: > { %s1560_s26 = sld [smem:[#allocation21_spill]]  ;;  %s493_s21 = sshll.u32 %s1417_s2, 4  ;;  %s494_s21 = int_to_ptr.vmem [resolvable:$true] %s493_s21 }
 0x1a1   : > { %s1562_s6 = sld [smem:[#allocation35_spill]]  ;;  %s479_s27 = scalar_lea.sflag [#allocation5], %s1378_s17 }
 0x1a6   : > { %s676_s1 = sshll.u32 %s1560_s26, 3 }
 0x1a7   : > { %s1563_s15 = smov %s1562_s6  ;;  %s491_s14 = scalar_lea.hbm %s1562_s6, %s676_s1 }
 0x1a8   : > { %s495_s4 = sshll.u32 %s491_s14, 4  ;;  %s971_s10 = scalar_lea.hbm %s1563_s15, 16  ;;  %s496_s4 = int_to_ptr.hbm [resolvable:$true] %s495_s4 }
 0x1a9   : > { %s965_s9 = sshra.s32 %s496_s4, 4  ;;  %s966_s9 = int_to_ptr.hbm [resolvable:$true] %s965_s9 }
 0x1aa   : > { %s967_s7 = scalar_lea.hbm %s966_s9, 8  ;;  %p972_p3 = scmp.lt.s32.totalorder %s966_s9, %s1563_s15 }
 0x1ab   : > { %p968_p11 = scmp.ne.s32.totalorder %s966_s9, %s967_s7  ;;  %p973_p2 = scmp.lt.s32.totalorder %s971_s10, %s967_s7 }
 0x1ad   : > { %p969_p13 = pnand %p968_p11, %p1309_p0  ;;  %p974_p9 = por %p973_p2, %p972_p3 }
 0x1af   : > { %p970_p1 = pneg %p969_p13 }
 0x1b1   : > { %p975_p10 = pnand %p974_p9, %p970_p1 }
 0x1b3   : > { %978 = shalt.err (!%p975_p10)
}
 0x1b4   : > { %690 = dma.vmem_to_hbm [thread:$0]  (%p1309_p0), %s494_s21, 128, %s496_s4, %s479_s27  }
 0x1b5 PF: > { %s1564_s17 = sld [smem:[#allocation23_spill]] }
 0x1b6   : > { %s1565_s2 = sld [smem:[#allocation17_spill]] }
 0x1bb   : > { %p713_p5 = scmp.ge.s32.totalorder %s1564_s17, 2 }
 0x1bc   : > { %s507_s8 = sand.u32 1, %s1565_s2  }
 0x1bd   : > { %p707_p4 = pnand %p713_p5, %p1235_p8  ;;  %s508_s29 = scalar_lea.sflag [#allocation5], %s507_s8 }
 0x1bf   : > { %p708_p6 = pneg %p707_p4 }
 0x1c1   : > { %1052 = dma.done.wait (%p708_p6), %s508_s29, 128  }
 0x1c2   : > { %1054 = vsyncadd (%p708_p6), %s508_s29, 4294967168  ;;  %s27_s6 = sadd.s32 1, %s1564_s17   ;;  %s1568_s0 = sld [smem:[#allocation29_spill]] }
 0x1c3   : > { %p1451_p12 = scmp.ge.s32.totalorder %s27_s6, 6   ;;  %s1569_s26 = sld [smem:[#allocation18_spill]] }
 0x1c4   : > { %s1570_s23 = sld [smem:[#allocation28_spill]]  ;;  %s1576_s18 = smov %s1061_s19 }
 0x1c5   : > { %s1571_s12 = sld [smem:[#allocation19_spill]]  ;;  %s1577_s19 = smov %s1065_s20 }
 0x1c6   : > { %s1572_s1 = sld [smem:[#allocation27_spill]]  ;;  %s1579_s21 = smov %s1073_s22 }
 0x1c7   : > { %s1573_s27 = sld [smem:[#allocation22_spill]]  ;;  %s1581_s24 = smov %s1085_s25 }
 0x1c8   : > { %s1574_s29 = sld [smem:[#allocation25_spill]]  ;;  %s1578_s20 = smov %s1568_s0 }
 0x1c9   : > { %s1575_s14 = sld [smem:[#allocation26_spill]]  ;;  %s1580_s22 = smov %s1569_s26 }
 0x1ca   : > { %s1584_s28 = smov %s1105_s30 }
 0x1cb   : > { %s1582_s25 = smov %s1571_s12  ;;  %26 = sbr.rel (!%p1451_p12) target bundleno = 20 (0x14), region = 131 }
 0x1cc   : > { %s1583_s26 = smov %s1572_s1 }
 0x1cf   : > { %s1585_s30 = smov %s1575_s14 }
 0x1d0   :  { %514 = vsyncpa [#allocation4], 1 }
 0x1d1   :  { %516 = vsyncpa [#allocation4 + $0x1], 1 }
 0x1d2   :  { %517 = vsyncpa [#allocation7], 1 }
 0x1d3   :  { %519 = vsyncpa [#allocation7 + $0x1], 1 }
 0x1d4   :  { %520 = vsyncpa [#allocation10], 1 }
 0x1d5   :  { %522 = vsyncpa [#allocation10 + $0x1], 1 }
 0x1d6   :  { %523 = vsyncpa [#allocation5], 1 }
 0x1d7   :  { %525 = vsyncpa [#allocation5 + $0x1], 1 }

</bundles_post_ra>
